<compile_context>
chip_gen: v7x
topology: tpu7x:2x2x1
jax: 0.10.0
libtpu: 0.0.40
codegen_flags: <defaults>
</compile_context>

<pallas_src>
import math
from functools import partial

import jax
import jax.numpy as jnp
import numpy as np
from jax.experimental import pallas as pl
from jax.experimental.pallas import tpu as pltpu

EPS = 1e-5
# v7x has 64 MiB VMEM per TensorCore (vs 128 MiB on v5e/v6e); keep the scoped
# request well under that so 4 MiB read+write tiles still double-buffer cleanly.
_VMEM_LIMIT = 48 * 1024 * 1024


def _cdiv(a, b):
    return -(-a // b)


def _round_up(a, b):
    return _cdiv(a, b) * b


def _plan_layout(f):
    """Pick (fold k, lane width W).

    k consecutive rows are folded into the lane axis so W = k*F is a multiple
    of 128 (lane-dense stores); k = 128/gcd(F,128) is always a power of two.
    If the folded width would exceed 1024 lanes, fall back to k=1 and pad the
    feature axis up to the next multiple of 128 instead.
    """
    k = 128 // math.gcd(f, 128)
    if k * f <= 1024:
        return k, k * f
    return 1, _round_up(f, 128)


def _expand_mask(m, width, feat):
    """Expand a lane-dense (kp, tg) 0/1 row-group mask to (tg, width).

    me[g, j] = m[j // feat, g].  One single-pass bf16 MXU matmul against a 0/1
    selector built in-registers (never touches HBM):
        e[i, j] = (i*feat <= j < (i+1)*feat)
    Exact for 0/1 operands; the narrow mask stays contiguous in VMEM.
    """
    kp = m.shape[0]
    lane = jax.lax.broadcasted_iota(jnp.int32, (kp, width), 1)
    slot = jax.lax.broadcasted_iota(jnp.int32, (kp, width), 0)
    lo = slot * feat
    e = ((lane >= lo) & (lane < lo + feat)).astype(m.dtype)
    # (kp, tg)^T @ (kp, width) -> (tg, width), accumulated in f32.
    return jax.lax.dot_general(m, e, (((0,), (0,)), ((), ())),
                               preferred_element_type=jnp.float32)


# ---------------------------------------------------------------------------
# Kernel 1 (training): masked per-feature sum / sum-of-squares  (reduction)
#   x_ref : (tg, W)   folded activations, W = k*F (or padded F)
#   m_ref : (kp, tg)  lane-dense 0/1 row-group mask (bf16)
#   sum/sq: (8, W)    per-chunk partials (final sublane reduce in the wrapper)
# ---------------------------------------------------------------------------
def _masked_stats_kernel(x_ref, m_ref, sum_ref, sq_ref, *, feat):
    @pl.when(pl.program_id(1) == 0)
    def _():
        sum_ref[...] = jnp.zeros_like(sum_ref)
        sq_ref[...] = jnp.zeros_like(sq_ref)

    x = x_ref[...].astype(jnp.float32)                     # (tg, W)
    me = _expand_mask(m_ref[...], x.shape[1], feat)        # (tg, W), exact 0/1
    xm = x * me
    r, w = x.shape[0] // 8, x.shape[1]
    # fold the row tile onto 8 sublanes with pure vreg adds (~4 VALU ops/vreg,
    # well under the HBM roofline on v5e/v6e/v7x); no per-step XLU reduction.
    sum_ref[...] += jnp.sum(xm.reshape(r, 8, w), axis=0)
    sq_ref[...] += jnp.sum((xm * x).reshape(r, 8, w), axis=0)


# ---------------------------------------------------------------------------
# Kernel 2 (training): normalize masked rows, pass through unmasked rows
# ---------------------------------------------------------------------------
def _masked_apply_kernel(x_ref, m_ref, scale_ref, shift_ref, o_ref, *, feat):
    x = x_ref[...].astype(jnp.float32)
    y = x * scale_ref[...] + shift_ref[...]
    me = _expand_mask(m_ref[...], x.shape[1], feat)
    # blend: me==1 -> normalized, me==0 -> exact passthrough of x.
    o_ref[...] = (x + me * (y - x)).astype(o_ref.dtype)


# ---------------------------------------------------------------------------
# Kernel 3 (eval): plain affine with running stats, no mask input at all
# ---------------------------------------------------------------------------
def _affine_kernel(x_ref, scale_ref, shift_ref, o_ref):
    x = x_ref[...].astype(jnp.float32)
    o_ref[...] = (x * scale_ref[...] + shift_ref[...]).astype(o_ref.dtype)


# ---------------------------------------------------------------------------
# Wrapper
# ---------------------------------------------------------------------------
def masked_norm_batch(x, mask, gamma, beta, running_mean, running_var, *,
                      training=True, block_target_bytes=4 << 20, stats_chunks=2):
    """MaskedNorm.forward for norm_type='batch'.

    x:    [B, T, F] (any shape whose trailing dim is F), mask: [B, T] (>0 = valid)
    returns [B, -1, F]
    """
    B = x.shape[0]
    F = x.shape[-1]
    xr = x.reshape(-1, F)
    N = xr.shape[0]

    # ---- layout / tile planning (all static Python) ----
    k, W = _plan_layout(F)                  # rows folded into lanes, lane width
    kp = max(k, 8)                          # mask sublane rows (zero-padded)
    itemsize = np.dtype(x.dtype).itemsize
    sub_align = max(8, 32 // itemsize)      # f32: 8, bf16: 16, int8: 32

    ng = _cdiv(N, k)                        # folded row-groups
    tg_max = max(128, (block_target_bytes // (W * itemsize)) // 128 * 128)
    if _round_up(ng, sub_align) <= tg_max:
        tg = _round_up(ng, sub_align)       # single block (block == full array)
        nblocks = 1
    else:
        tg = tg_max                         # multiple of 128 -> lane-dense mask
        nblocks = _cdiv(ng, tg)
    # Chunked 'parallel' reduction: lets v7x's two TensorCores split the stats
    # pass; on single-core chips the extra partial is negligible overhead.
    C = stats_chunks if (training and stats_chunks > 1 and nblocks >= 2) else 1
    S = _cdiv(nblocks, C)
    ng_pad = C * S * tg
    n_pad = ng_pad * k

    mask_flat = mask.reshape(-1) > 0
    count = jnp.maximum(jnp.sum(mask_flat.astype(jnp.float32)), 1.0)

    if n_pad != N:
        xr = jnp.pad(xr, ((0, n_pad - N), (0, 0)))
        mask_flat = jnp.pad(mask_flat, ((0, n_pad - N),))
    if W != k * F:                          # k == 1: pad feature axis to 128 lanes
        xr = jnp.pad(xr, ((0, 0), (0, W - F)))

    xf = xr.reshape(ng_pad, W)              # free reshape
    # lane-dense mask: (kp, ng_pad) bf16, row i = fold slot i, bottom rows zero
    mg = mask_flat.astype(jnp.bfloat16).reshape(ng_pad, k).T
    if kp != k:
        mg = jnp.pad(mg, ((0, kp - k), (0, 0)))

    gamma_f = gamma.reshape(F).astype(jnp.float32)
    beta_f = beta.reshape(F).astype(jnp.float32)

    def _fold_affine(scale, shift):
        sc = jnp.pad(jnp.tile(scale, (k,)), (0, W - k * F)).reshape(1, W)
        sh = jnp.pad(jnp.tile(shift, (k,)), (0, W - k * F)).reshape(1, W)
        return sc, sh

    if training:
        sums_p, sq_p = pl.pallas_call(
            partial(_masked_stats_kernel, feat=F),
            out_shape=(jax.ShapeDtypeStruct((C * 8, W), jnp.float32),
                       jax.ShapeDtypeStruct((C * 8, W), jnp.float32)),
            grid_spec=pltpu.PrefetchScalarGridSpec(
                num_scalar_prefetch=0,
                grid=(C, S),
                in_specs=[pl.BlockSpec((tg, W), lambda c, s: (c * S + s, 0)),
                          pl.BlockSpec((kp, tg), lambda c, s: (0, c * S + s))],
                out_specs=(pl.BlockSpec((8, W), lambda c, s: (c, 0)),
                           pl.BlockSpec((8, W), lambda c, s: (c, 0)))),
            compiler_params=pltpu.CompilerParams(
                dimension_semantics=("parallel", "arbitrary"),
                vmem_limit_bytes=_VMEM_LIMIT),
        )(xf, mg)

        # tiny (F,)-sized math: plain XLA (count over the original mask only)
        sums = sums_p.sum(axis=0)[: k * F].reshape(k, F).sum(axis=0)   # (F,)
        sqs = sq_p.sum(axis=0)[: k * F].reshape(k, F).sum(axis=0)      # (F,)
        mean = sums / count
        var = jnp.maximum(sqs / count - mean * mean, 0.0)              # biased var (BN)
        scale = gamma_f / jnp.sqrt(var + EPS)
        shift = beta_f - mean * scale
        scale_t, shift_t = _fold_affine(scale, shift)

        out = pl.pallas_call(
            partial(_masked_apply_kernel, feat=F),
            out_shape=jax.ShapeDtypeStruct((ng_pad, W), x.dtype),
            grid_spec=pltpu.PrefetchScalarGridSpec(
                num_scalar_prefetch=0,
                grid=(C * S,),
                in_specs=[pl.BlockSpec((tg, W), lambda i: (i, 0)),
                          pl.BlockSpec((kp, tg), lambda i: (0, i)),
                          pl.BlockSpec((1, W), lambda i: (0, 0)),
                          pl.BlockSpec((1, W), lambda i: (0, 0))],
                out_specs=pl.BlockSpec((tg, W), lambda i: (i, 0))),
            compiler_params=pltpu.CompilerParams(
                dimension_semantics=("parallel",),
                vmem_limit_bytes=_VMEM_LIMIT),
            input_output_aliases={0: 0},    # write back in place (HBM footprint)
        )(xf, mg, scale_t, shift_t)
    else:
        mean = running_mean.reshape(F).astype(jnp.float32)
        var = running_var.reshape(F).astype(jnp.float32)
        scale = gamma_f / jnp.sqrt(var + EPS)
        shift = beta_f - mean * scale
        scale_t, shift_t = _fold_affine(scale, shift)

        out = pl.pallas_call(
            _affine_kernel,
            out_shape=jax.ShapeDtypeStruct((ng_pad, W), x.dtype),
            grid_spec=pltpu.PrefetchScalarGridSpec(
                num_scalar_prefetch=0,
                grid=(C * S,),
                in_specs=[pl.BlockSpec((tg, W), lambda i: (i, 0)),
                          pl.BlockSpec((1, W), lambda i: (0, 0)),
                          pl.BlockSpec((1, W), lambda i: (0, 0))],
                out_specs=pl.BlockSpec((tg, W), lambda i: (i, 0))),
            compiler_params=pltpu.CompilerParams(
                dimension_semantics=("parallel",),
                vmem_limit_bytes=_VMEM_LIMIT),
            input_output_aliases={0: 0},
        )(xf, scale_t, shift_t)

    out = out[:, : k * F].reshape(n_pad, F)
    if n_pad != N:
        out = out[:N]
    return out.reshape(B, -1, F)


# ---------------------------------------------------------------------------
# Pure-numpy references of the PyTorch forward
# ---------------------------------------------------------------------------
def _reference_training(x, mask, gamma, beta):
    F = x.shape[-1]
    xr = np.asarray(x).reshape(-1, F).astype(np.float64)
    m = np.asarray(mask).reshape(-1) > 0
    sel = xr[m]                                   # masked_select
    mean = sel.mean(axis=0)
    var = sel.var(axis=0)                         # biased var, as BN uses to norm
    normed = (sel - mean) / np.sqrt(var + EPS) * np.asarray(gamma) + np.asarray(beta)
    out = xr.copy()
    out[m] = normed                               # masked_scatter
    return out.reshape(x.shape[0], -1, F)


def _reference_eval(x, gamma, beta, rm, rv):
    F = x.shape[-1]
    xr = np.asarray(x).reshape(-1, F).astype(np.float64)
    out = (xr - np.asarray(rm)) / np.sqrt(np.asarray(rv) + EPS) * np.asarray(gamma) \
          + np.asarray(beta)
    return out.reshape(x.shape[0], -1, F)


if __name__ == "__main__":
    run = jax.jit(masked_norm_batch,
                  static_argnames=("training", "block_target_bytes", "stats_chunks"))

    key = jax.random.PRNGKey(0)
    kx, kg, kb, kx2, kx3, kg3, kb3 = jax.random.split(key, 7)

    # ------------------- small test (B=2, T=8, F=32) -------------------
    B, T, F = 2, 8, 32
    x = jax.random.normal(kx, (B, T, F), dtype=jnp.float32)
    lengths = jnp.array([6, 3])
    mask = (jnp.arange(T)[None, :] < lengths[:, None]).astype(jnp.float32)

    gamma = 1.0 + 0.1 * jax.random.normal(kg, (F,), dtype=jnp.float32)
    beta = 0.1 * jax.random.normal(kb, (F,), dtype=jnp.float32)
    running_mean = jnp.zeros((F,), jnp.float32)
    running_var = jnp.ones((F,), jnp.float32)

    out = jax.block_until_ready(
        run(x, mask, gamma, beta, running_mean, running_var, training=True))
    ref = _reference_training(x, mask, gamma, beta)
    assert out.shape == (B, T, F)
    np.testing.assert_allclose(np.asarray(out), ref, rtol=1e-4, atol=1e-4)

    out_eval = jax.block_until_ready(
        run(x, mask, gamma, beta, running_mean, running_var, training=False))
    ref_eval = _reference_eval(x, gamma, beta, running_mean, running_var)
    assert out_eval.shape == (B, T, F)
    np.testing.assert_allclose(np.asarray(out_eval), ref_eval, rtol=1e-4, atol=1e-4)

    # ------ multi-block / multi-chunk test (forces grid=(2, S), S>1) ------
    B2, T2 = 2, 2048
    x2 = jax.random.normal(kx2, (B2, T2, F), dtype=jnp.float32)
    lengths2 = jnp.array([1500, 700])
    mask2 = (jnp.arange(T2)[None, :] < lengths2[:, None]).astype(jnp.float32)

    out2 = jax.block_until_ready(
        run(x2, mask2, gamma, beta, running_mean, running_var,
            training=True, block_target_bytes=64 << 10))
    ref2 = _reference_training(x2, mask2, gamma, beta)
    assert out2.shape == (B2, T2, F)
    np.testing.assert_allclose(np.asarray(out2), ref2, rtol=1e-4, atol=1e-4)

    # ---- non-power-of-two feature width (F=48 -> fold k=8, W=384) ----
    B3, T3, F3 = 2, 16, 48
    x3 = jax.random.normal(kx3, (B3, T3, F3), dtype=jnp.float32)
    lengths3 = jnp.array([11, 5])
    mask3 = (jnp.arange(T3)[None, :] < lengths3[:, None]).astype(jnp.float32)
    gamma3 = 1.0 + 0.1 * jax.random.normal(kg3, (F3,), dtype=jnp.float32)
    beta3 = 0.1 * jax.random.normal(kb3, (F3,), dtype=jnp.float32)

    out3 = jax.block_until_ready(
        run(x3, mask3, gamma3, beta3,
            jnp.zeros((F3,), jnp.float32), jnp.ones((F3,), jnp.float32),
            training=True))
    ref3 = _reference_training(x3, mask3, gamma3, beta3)
    assert out3.shape == (B3, T3, F3)
    np.testing.assert_allclose(np.asarray(out3), ref3, rtol=1e-4, atol=1e-4)

    print("KERNEL_OK")
</pallas_src>

<mosaic_0001>
module attributes {stable_mosaic.version = 11 : i64} {
  func.func @_masked_stats_kernel(%arg0: i32, %arg1: i32, %arg2: memref<8x128xf32, #tpu.memory_space<vmem>>, %arg3: memref<8x8xbf16, #tpu.memory_space<vmem>>, %arg4: memref<8x128xf32, #tpu.memory_space<vmem>>, %arg5: memref<8x128xf32, #tpu.memory_space<vmem>>) attributes {dimension_semantics = [#tpu.dimension_semantics<parallel>, #tpu.dimension_semantics<arbitrary>], iteration_bounds = array<i64: 1, 1>, scalar_prefetch = 0 : i64, scratch_operands = 0 : i64, tpu.core_type = #tpu.core_type<tc>, window_params = [{transform_indices = @transform_0, window_bounds = array<i64: 8, 128>}, {transform_indices = @transform_1, window_bounds = array<i64: 8, 8>}, {transform_indices = @transform_2, window_bounds = array<i64: 8, 128>}, {transform_indices = @transform_3, window_bounds = array<i64: 8, 128>}]} {
    %c0_i32 = arith.constant 0 : i32
    %0 = arith.cmpi eq, %arg1, %c0_i32 : i32
    %1 = arith.extui %0 : i1 to i32
    %c0_i32_0 = arith.constant 0 : i32
    %2 = arith.cmpi ne, %1, %c0_i32_0 : i32
    scf.if %2 {
      %cst_15 = arith.constant 0.000000e+00 : f32
      %30 = vector.broadcast %cst_15 : f32 to vector<8x128xf32>
      %c0_16 = arith.constant 0 : index
      %c0_17 = arith.constant 0 : index
      %31 = vector.load %arg4[%c0_16, %c0_17] : memref<8x128xf32, #tpu.memory_space<vmem>>, vector<8x128xf32>
      tpu.vector_store %arg4[%c0_16, %c0_17], %30 {strides = array<i32>} : memref<8x128xf32, #tpu.memory_space<vmem>>, vector<8x128xf32>,
      %cst_18 = arith.constant 0.000000e+00 : f32
      %32 = vector.broadcast %cst_18 : f32 to vector<8x128xf32>
      %c0_19 = arith.constant 0 : index
      %c0_20 = arith.constant 0 : index
      %33 = vector.load %arg5[%c0_19, %c0_20] : memref<8x128xf32, #tpu.memory_space<vmem>>, vector<8x128xf32>
      tpu.vector_store %arg5[%c0_19, %c0_20], %32 {strides = array<i32>} : memref<8x128xf32, #tpu.memory_space<vmem>>, vector<8x128xf32>,
    } else {
    }
    %c0 = arith.constant 0 : index
    %c0_1 = arith.constant 0 : index
    %3 = vector.load %arg2[%c0, %c0_1] : memref<8x128xf32, #tpu.memory_space<vmem>>, vector<8x128xf32>
    %c0_2 = arith.constant 0 : index
    %c0_3 = arith.constant 0 : index
    %4 = vector.load %arg3[%c0_2, %c0_3] : memref<8x8xbf16, #tpu.memory_space<vmem>>, vector<8x8xbf16>
    %5 = tpu.iota {dimensions = array<i32: 1>} : vector<8x128xi32>
    %6 = tpu.iota {dimensions = array<i32: 0>} : vector<8x128xi32>
    %c32_i32 = arith.constant 32 : i32
    %7 = vector.broadcast %c32_i32 : i32 to vector<8x128xi32>
    %8 = arith.muli %6, %7 : vector<8x128xi32>
    %9 = arith.cmpi sge, %5, %8 : vector<8x128xi32>
    %c32_i32_4 = arith.constant 32 : i32
    %10 = vector.broadcast %c32_i32_4 : i32 to vector<8x128xi32>
    %11 = arith.addi %8, %10 : vector<8x128xi32>
    %12 = arith.cmpi slt, %5, %11 : vector<8x128xi32>
    %13 = arith.andi %9, %12 : vector<8x128xi1>
    %14 = arith.extui %13 : vector<8x128xi1> to vector<8x128xi32>
    %15 = arith.sitofp %14 : vector<8x128xi32> to vector<8x128xf32>
    %16 = arith.truncf %15 : vector<8x128xf32> to vector<8x128xbf16>
    %cst = arith.constant dense<0.000000e+00> : vector<8x128xf32>
    %17 = tpu.matmul %4, %16, %cst {dimension_numbers = #tpu.dot_dimension_numbers<[0], [0], [1], [1], [0, 1, 1, 1], [], []>} : vector<8x8xbf16>, vector<8x128xbf16>, vector<8x128xf32> -> vector<8x128xf32>
    %18 = arith.mulf %3, %17 : vector<8x128xf32>
    %c0_5 = arith.constant 0 : index
    %c0_6 = arith.constant 0 : index
    %19 = vector.load %arg4[%c0_5, %c0_6] : memref<8x128xf32, #tpu.memory_space<vmem>>, vector<8x128xf32>
    %20 = vector.shape_cast %18 : vector<8x128xf32> to vector<1x8x128xf32>
    %cst_7 = arith.constant dense<0.000000e+00> : vector<8x128xf32>
    %21 = vector.multi_reduction <add>, %20, %cst_7 [0] : vector<1x8x128xf32> to vector<8x128xf32>
    %22 = arith.addf %19, %21 : vector<8x128xf32>
    %c0_8 = arith.constant 0 : index
    %c0_9 = arith.constant 0 : index
    %23 = vector.load %arg4[%c0_8, %c0_9] : memref<8x128xf32, #tpu.memory_space<vmem>>, vector<8x128xf32>
    tpu.vector_store %arg4[%c0_8, %c0_9], %22 {strides = array<i32>} : memref<8x128xf32, #tpu.memory_space<vmem>>, vector<8x128xf32>,
    %c0_10 = arith.constant 0 : index
    %c0_11 = arith.constant 0 : index
    %24 = vector.load %arg5[%c0_10, %c0_11] : memref<8x128xf32, #tpu.memory_space<vmem>>, vector<8x128xf32>
    %25 = arith.mulf %18, %3 : vector<8x128xf32>
    %26 = vector.shape_cast %25 : vector<8x128xf32> to vector<1x8x128xf32>
    %cst_12 = arith.constant dense<0.000000e+00> : vector<8x128xf32>
    %27 = vector.multi_reduction <add>, %26, %cst_12 [0] : vector<1x8x128xf32> to vector<8x128xf32>
    %28 = arith.addf %24, %27 : vector<8x128xf32>
    %c0_13 = arith.constant 0 : index
    %c0_14 = arith.constant 0 : index
    %29 = vector.load %arg5[%c0_13, %c0_14] : memref<8x128xf32, #tpu.memory_space<vmem>>, vector<8x128xf32>
    tpu.vector_store %arg5[%c0_13, %c0_14], %28 {strides = array<i32>} : memref<8x128xf32, #tpu.memory_space<vmem>>, vector<8x128xf32>,
    return
  }
  func.func @transform_0(%arg0: i32, %arg1: i32) -> (i32, i32) {
    %c1_i32 = arith.constant 1 : i32
    %0 = arith.muli %arg0, %c1_i32 : i32
    %1 = arith.addi %0, %arg1 : i32
    %c0_i32 = arith.constant 0 : i32
    %c0_i32_0 = arith.constant 0 : i32
    return %1, %c0_i32 : i32, i32
  }
  func.func @transform_1(%arg0: i32, %arg1: i32) -> (i32, i32) {
    %c1_i32 = arith.constant 1 : i32
    %0 = arith.muli %arg0, %c1_i32 : i32
    %1 = arith.addi %0, %arg1 : i32
    %c0_i32 = arith.constant 0 : i32
    %c0_i32_0 = arith.constant 0 : i32
    return %c0_i32, %1 : i32, i32
  }
  func.func @transform_2(%arg0: i32, %arg1: i32) -> (i32, i32) {
    %c0_i32 = arith.constant 0 : i32
    %c0_i32_0 = arith.constant 0 : i32
    return %arg0, %c0_i32 : i32, i32
  }
  func.func @transform_3(%arg0: i32, %arg1: i32) -> (i32, i32) {
    %c0_i32 = arith.constant 0 : i32
    %c0_i32_0 = arith.constant 0 : i32
    return %arg0, %c0_i32 : i32, i32
  }
}

module attributes {stable_mosaic.version = 11 : i64} {
  func.func @_masked_apply_kernel(%arg0: i32, %arg1: memref<8x128xf32, #tpu.memory_space<vmem>>, %arg2: memref<8x8xbf16, #tpu.memory_space<vmem>>, %arg3: memref<1x128xf32, #tpu.memory_space<vmem>>, %arg4: memref<1x128xf32, #tpu.memory_space<vmem>>, %arg5: memref<8x128xf32, #tpu.memory_space<vmem>>) attributes {dimension_semantics = [#tpu.dimension_semantics<parallel>], iteration_bounds = array<i64: 1>, scalar_prefetch = 0 : i64, scratch_operands = 0 : i64, tpu.core_type = #tpu.core_type<tc>, window_params = [{transform_indices = @transform_0, window_bounds = array<i64: 8, 128>}, {transform_indices = @transform_1, window_bounds = array<i64: 8, 8>}, {pipeline_mode = #tpu.pipeline_mode<synchronous>, transform_indices = @transform_2, window_bounds = array<i64: 1, 128>}, {pipeline_mode = #tpu.pipeline_mode<synchronous>, transform_indices = @transform_3, window_bounds = array<i64: 1, 128>}, {transform_indices = @transform_4, window_bounds = array<i64: 8, 128>}]} {
    %c0 = arith.constant 0 : index
    %c0_0 = arith.constant 0 : index
    %0 = vector.load %arg1[%c0, %c0_0] : memref<8x128xf32, #tpu.memory_space<vmem>>, vector<8x128xf32>
    %c0_1 = arith.constant 0 : index
    %c0_2 = arith.constant 0 : index
    %1 = vector.load %arg3[%c0_1, %c0_2] : memref<1x128xf32, #tpu.memory_space<vmem>>, vector<1x128xf32>
    %2 = vector.broadcast %1 : vector<1x128xf32> to vector<8x128xf32>
    %3 = arith.mulf %0, %2 : vector<8x128xf32>
    %c0_3 = arith.constant 0 : index
    %c0_4 = arith.constant 0 : index
    %4 = vector.load %arg4[%c0_3, %c0_4] : memref<1x128xf32, #tpu.memory_space<vmem>>, vector<1x128xf32>
    %5 = vector.broadcast %4 : vector<1x128xf32> to vector<8x128xf32>
    %6 = arith.addf %3, %5 : vector<8x128xf32>
    %c0_5 = arith.constant 0 : index
    %c0_6 = arith.constant 0 : index
    %7 = vector.load %arg2[%c0_5, %c0_6] : memref<8x8xbf16, #tpu.memory_space<vmem>>, vector<8x8xbf16>
    %8 = tpu.iota {dimensions = array<i32: 1>} : vector<8x128xi32>
    %9 = tpu.iota {dimensions = array<i32: 0>} : vector<8x128xi32>
    %c32_i32 = arith.constant 32 : i32
    %10 = vector.broadcast %c32_i32 : i32 to vector<8x128xi32>
    %11 = arith.muli %9, %10 : vector<8x128xi32>
    %12 = arith.cmpi sge, %8, %11 : vector<8x128xi32>
    %c32_i32_7 = arith.constant 32 : i32
    %13 = vector.broadcast %c32_i32_7 : i32 to vector<8x128xi32>
    %14 = arith.addi %11, %13 : vector<8x128xi32>
    %15 = arith.cmpi slt, %8, %14 : vector<8x128xi32>
    %16 = arith.andi %12, %15 : vector<8x128xi1>
    %17 = arith.extui %16 : vector<8x128xi1> to vector<8x128xi32>
    %18 = arith.sitofp %17 : vector<8x128xi32> to vector<8x128xf32>
    %19 = arith.truncf %18 : vector<8x128xf32> to vector<8x128xbf16>
    %cst = arith.constant dense<0.000000e+00> : vector<8x128xf32>
    %20 = tpu.matmul %7, %19, %cst {dimension_numbers = #tpu.dot_dimension_numbers<[0], [0], [1], [1], [0, 1, 1, 1], [], []>} : vector<8x8xbf16>, vector<8x128xbf16>, vector<8x128xf32> -> vector<8x128xf32>
    %21 = arith.subf %6, %0 : vector<8x128xf32>
    %22 = arith.mulf %20, %21 : vector<8x128xf32>
    %23 = arith.addf %0, %22 : vector<8x128xf32>
    %c0_8 = arith.constant 0 : index
    %c0_9 = arith.constant 0 : index
    %24 = vector.load %arg5[%c0_8, %c0_9] : memref<8x128xf32, #tpu.memory_space<vmem>>, vector<8x128xf32>
    tpu.vector_store %arg5[%c0_8, %c0_9], %23 {strides = array<i32>} : memref<8x128xf32, #tpu.memory_space<vmem>>, vector<8x128xf32>,
    return
  }
  func.func @transform_0(%arg0: i32) -> (i32, i32) {
    %c0_i32 = arith.constant 0 : i32
    %c0_i32_0 = arith.constant 0 : i32
    return %arg0, %c0_i32 : i32, i32
  }
  func.func @transform_1(%arg0: i32) -> (i32, i32) {
    %c0_i32 = arith.constant 0 : i32
    %c0_i32_0 = arith.constant 0 : i32
    return %c0_i32, %arg0 : i32, i32
  }
  func.func @transform_2(%arg0: i32) -> (i32, i32) {
    %c0_i32 = arith.constant 0 : i32
    %c0_i32_0 = arith.constant 0 : i32
    %c0_i32_1 = arith.constant 0 : i32
    return %c0_i32, %c0_i32_0 : i32, i32
  }
  func.func @transform_3(%arg0: i32) -> (i32, i32) {
    %c0_i32 = arith.constant 0 : i32
    %c0_i32_0 = arith.constant 0 : i32
    %c0_i32_1 = arith.constant 0 : i32
    return %c0_i32, %c0_i32_0 : i32, i32
  }
  func.func @transform_4(%arg0: i32) -> (i32, i32) {
    %c0_i32 = arith.constant 0 : i32
    %c0_i32_0 = arith.constant 0 : i32
    return %arg0, %c0_i32 : i32, i32
  }
}

</mosaic_0001>

<bundles_post_ra>
// kernel: tile.13
= control target key start
LH: loop header
LB: loop body
LE: loop exit
PB: predicated region body
PF: predicated region fallthrough
CT: control target
= control target key end

     0   :  { %s22_s0 = inlined_call_operand.vmem [shape: f32[32], index: 0, kind: input, shape index: {}]   ;;  %s23_s1 = inlined_call_operand.vmem [shape: f32[4,32], index: 1, kind: output, shape index: {}]  }
   0x1   :  { %v4_v0 = vld [vmem:[%s22_s0] ss:$0 sm:$0xff] }
   0x2   :  { %5 = vst [vmem:[%s23_s1] sm:$0xf] %v4_v0 }

// kernel: masked_norm_batch.3
= control target key start
LH: loop header
LB: loop body
LE: loop exit
PB: predicated region body
PF: predicated region fallthrough
CT: control target
= control target key end

     0   :  { %v36_v0 = vlaneseq  ;;  %v135_v2 = vmov 0.0   ;;  %vm136_vm0 = vmmov 0   ;;  %vm68_vm4 = vcmask 1043456   ;;  %s177_s1 = inlined_call_operand.vmem [shape: bf16[8,8], index: 1, kind: input, shape index: {}]   ;;  %s178_s0 = inlined_call_operand.vmem [shape: f32[8,128], index: 0, kind: input, shape index: {}, may-alias: {0,4}]   ;;  %s179_s2 = inlined_call_operand.vmem [shape: f32[1,128], index: 2, kind: input, shape index: {}]   ;;  %s180_s3 = inlined_call_operand.vmem [shape: f32[1,128], index: 3, kind: input, shape index: {}]   ;;  %s181_s4 = inlined_call_operand.vmem [shape: f32[8,128], index: 4, kind: output, shape index: {}, may-alias: {0,4}]  }
   0x1   :  { %v35_v1 = vld [vmem:[%s177_s1] sm:$0xf]  ;;  %126 = vmatprep.subr.bf16.mxu0 %v135_v2  ;;  %128 = vmatprep.mubr.msk.bf16.mxu0 %vm136_vm0, %v135_v2  ;;  %vm64_vm5 = vcmask 64512  }
   0x2   :  { %48 = vxpose.xlu0.c.b16.start.end [1/1] (short) (narrow) %v35_v1, 16  ;;  %v37_v3 = vand.u32 127, %v36_v0  ;;  %v39_v4 = vshrl.u32 %v36_v0, 7  ;;  %v18_v11 = vld [vmem:[%s178_s0] sm:$0xff] }
   0x3   :  { %v120_v12 = vld [vmem:[%s179_s2] ss:$0 sm:$0xff] }
   0x4   :  { %v40_v5 = vmul.u32 32, %v39_v4  ;;  %v26_v13 = vmul.f32 %v120_v12, %v18_v11  ;;  %v121_v14 = vld [vmem:[%s180_s3] ss:$0 sm:$0xff] }
   0x6   :  { %vm41_vm1 = vcmp.ge.s32.totalorder %v37_v3, %v40_v5  ;;  %v42_v6 = vadd.s32 32, %v40_v5  ;;  %v34_v15 = vadd.f32 %v121_v14, %v26_v13 }
   0x8   :  { %vm43_vm2 = vcmp.lt.s32.totalorder %v37_v3, %v42_v6  ;;  %v112_v16 = vsub.f32 %v34_v15, %v18_v11 }
   0x9   :  { %vm44_vm3 = vmand %vm41_vm1, %vm43_vm2 }
   0xa   :  { %v122_v7 = vsel %vm44_vm3, 1.0, %v135_v2 }
   0xb   :  { %v47_v8 = vpack.c.bf16 %v122_v7, %v122_v7 }
   0xd   :  { %v70_v9 = vsel %vm68_vm4, %v47_v8, 0 }
   0xe   :  { %127 = vmatpush3.bf16.msra.mxu0 %v70_v9 }
  0x68   :  { %v56_v10 = vpop.trf.xlu0 }
  0x69   :  { %129 = vmatmul.mubr.msk.bf16.vlgmr.msra.gmra.mrb[0].mxu0 %vm64_vm5, %v56_v10 }
 0x13c   :  { %v106_v17 = vpop.f32.mrb[0].mxu0 }
 0x13d   :  { %v113_v18 = vmul.f32 %v112_v16, %v106_v17  ;;  %v130_v19 = vpop.f32.mrb[1].mxu0 }
 0x13e   :  { %v109_v20 = vpop.f32.mrb[2].mxu0 }
 0x13f   :  { %v114_v21 = vadd.f32 %v113_v18, %v18_v11  ;;  %v131_v22 = vpop.f32.mrb[3].mxu0 }
 0x141   :  { %115 = vst [vmem:[%s181_s4] sm:$0xff] %v114_v21 }

// kernel: masked_norm_batch.2
= control target key start
LH: loop header
LB: loop body
LE: loop exit
PB: predicated region body
PF: predicated region fallthrough
CT: control target
= control target key end

     0   :  { %v56_v0 = vlaneseq  ;;  %v175_v2 = vmov 0.0   ;;  %vm176_vm0 = vmmov 0   ;;  %vm88_vm4 = vcmask 1043456   ;;  %s209_s1 = inlined_call_operand.vmem [shape: bf16[8,8], index: 1, kind: input, shape index: {}]   ;;  %s210_s0 = inlined_call_operand.vmem [shape: f32[8,128], index: 0, kind: input, shape index: {}]   ;;  %s211_s2 = inlined_call_operand.vmem [shape: f32[8,128], index: 2, kind: output, shape index: {0}]   ;;  %s212_s3 = inlined_call_operand.vmem [shape: f32[8,128], index: 3, kind: output, shape index: {1}]  }
   0x1   :  { %v55_v1 = vld [vmem:[%s209_s1] sm:$0xf]  ;;  %166 = vmatprep.subr.bf16.mxu0 %v175_v2  ;;  %168 = vmatprep.mubr.msk.bf16.mxu0 %vm176_vm0, %v175_v2  ;;  %vm84_vm5 = vcmask 64512  }
   0x2   :  { %68 = vxpose.xlu0.c.b16.start.end [1/1] (short) (narrow) %v55_v1, 16  ;;  %v57_v3 = vand.u32 127, %v56_v0  ;;  %v59_v4 = vshrl.u32 %v56_v0, 7  ;;  %v54_v11 = vld [vmem:[%s210_s0] sm:$0xff] }
   0x4   :  { %v60_v5 = vmul.u32 32, %v59_v4 }
   0x6   :  { %vm61_vm1 = vcmp.ge.s32.totalorder %v57_v3, %v60_v5  ;;  %v62_v6 = vadd.s32 32, %v60_v5 }
   0x8   :  { %vm63_vm2 = vcmp.lt.s32.totalorder %v57_v3, %v62_v6 }
   0x9   :  { %vm64_vm3 = vmand %vm61_vm1, %vm63_vm2 }
   0xa   :  { %v162_v7 = vsel %vm64_vm3, 1.0, %v175_v2 }
   0xb   :  { %v67_v8 = vpack.c.bf16 %v162_v7, %v162_v7 }
   0xd   :  { %v90_v9 = vsel %vm88_vm4, %v67_v8, 0 }
   0xe   :  { %167 = vmatpush3.bf16.msra.mxu0 %v90_v9 }
  0x68   :  { %v76_v10 = vpop.trf.xlu0 }
  0x69   :  { %169 = vmatmul.mubr.msk.bf16.vlgmr.msra.gmra.mrb[0].mxu0 %vm84_vm5, %v76_v10 }
 0x13c   :  { %v126_v12 = vpop.f32.mrb[0].mxu0 }
 0x13d   :  { %v132_v13 = vmul.f32 %v126_v12, %v54_v11  ;;  %v170_v14 = vpop.f32.mrb[1].mxu0 }
 0x13e   :  { %v129_v15 = vpop.f32.mrb[2].mxu0 }
 0x13f   :  { %v138_v16 = vmul.f32 %v132_v13, %v54_v11  ;;  %v171_v17 = vpop.f32.mrb[3].mxu0  ;;  %136 = vst [vmem:[%s211_s2] sm:$0xff] %v132_v13 }
 0x141   :  { %141 = vst [vmem:[%s212_s3] sm:$0xff] %v138_v16 }

</bundles_post_ra>
